<compile_context>
chip_gen: v5e
topology: v5e:2x2
jax: 0.10.0
libtpu: 0.0.40
codegen_flags: <defaults>
</compile_context>

<pallas_src>
import numpy as np
import jax
import jax.numpy as jnp
from jax.experimental import pallas as pl
from jax.experimental.pallas import tpu as pltpu


# ----------------------------- kernel -------------------------------------- #

def _projection_conv_kernel(x_ref, p_ref, wa_ref, wb_ref, x1_ref, x2_ref):
    """Whole batch in one invocation.

    x_ref : (B, C, H*W)   channels-first, lane-dense over pixels
    p_ref : (H*W, npix+1) pooling matrix (cols 0..npix-1: (s,s) bins, col npix: global)
    wa_ref: (C+1, 2*hid)  [w1 | wc1] with bias row appended
    wb_ref: (2*hid+1, 2*out) block-diag [[w2,0],[0,wc2]] with bias row appended
    x1_ref: (B, 1, out)
    x2_ref: (B, out, npix)
    """
    B, C, HW = x_ref.shape
    npix1 = p_ref.shape[1]
    npix = npix1 - 1
    hid2 = wb_ref.shape[0] - 1          # 2*hid
    out2 = wb_ref.shape[1]              # 2*out
    out = out2 // 2

    # Both pools as ONE MXU matmul over lane-dense (B*C, H*W) rows.
    xf = x_ref[...].reshape(B * C, HW)
    pooled = jnp.dot(xf, p_ref[...], preferred_element_type=jnp.float32)  # (B*C, npix+1)

    wa = wa_ref[0:C, :]                 # (C, 2*hid)
    ba = wa_ref[C:C + 1, :]             # (1, 2*hid)
    wb = wb_ref[0:hid2, :]              # (2*hid, 2*out)
    bb = wb_ref[hid2:hid2 + 1, :]       # (1, 2*out)

    # B is tiny and static -> unrolled; all ops below are plain 2-D (robust lowering).
    for b in range(B):
        m_b = pooled[b * C:(b + 1) * C, :]        # (C, npix+1), aligned slice
        rows = m_b.T                               # (npix+1, C)  tiny XLU transpose
        # Fused layer 1 (Linear + Conv1x1) -> 128-lane-dense hidden activation.
        h = jnp.maximum(
            jnp.dot(rows, wa, preferred_element_type=jnp.float32) + ba, 0.0)
        # Fused layer 2 (block-diagonal weights).
        y = jnp.dot(h, wb, preferred_element_type=jnp.float32) + bb      # (npix+1, 2*out)
        # x1: MLP branch on the global-pool row.
        x1_ref[b] = y[npix:npix + 1, 0:out].astype(x1_ref.dtype)         # (1, out)
        # x2: conv branch on the pooled pixels, emitted directly in (out, s*s) layout.
        x2_ref[b] = y[0:npix, out:out2].T.astype(x2_ref.dtype)           # (out, npix)


# --------------------------- param / const prep ----------------------------- #

def pack_params(params):
    """Pack the 8 Linear/Conv parameters (PyTorch (out,in) layout) into 2 arrays.

    Layer-1: [w1^T | wc1^T] with the concatenated bias appended as the last row
             -> (in_dim+1, 2*hid_dim).
    Layer-2: block-diag [[w2^T, 0], [0, wc2^T]] with the bias row appended
             -> (2*hid_dim+1, 2*out_dim).
    One-time cost (weights are static across forward calls).
    """
    w1, b1, w2, b2 = params["w1"], params["b1"], params["w2"], params["b2"]
    wc1, bc1, wc2, bc2 = params["wc1"], params["bc1"], params["wc2"], params["bc2"]
    hid = w1.shape[0]
    out = w2.shape[0]
    wa = jnp.concatenate([w1.T, wc1.T], axis=1)                       # (in, 2*hid)
    ba = jnp.concatenate([b1, bc1]).reshape(1, 2 * hid)
    zero = jnp.zeros((hid, out), dtype=w2.dtype)
    wb = jnp.concatenate(
        [jnp.concatenate([w2.T, zero], axis=1),
         jnp.concatenate([zero, wc2.T], axis=1)], axis=0)             # (2*hid, 2*out)
    bb = jnp.concatenate([b2, bc2]).reshape(1, 2 * out)
    wa_packed = jnp.concatenate([wa, ba], axis=0)                     # (in+1, 2*hid)
    wb_packed = jnp.concatenate([wb, bb], axis=0)                     # (2*hid+1, 2*out)
    return wa_packed, wb_packed


def _adaptive_pool_matrix(H, W, s):
    """Constant (H*W, npix+1) matrix implementing AdaptiveAvgPool2d((s,s)) (exact
    PyTorch bin boundaries, uneven bins supported) plus a global-average column."""
    if s:
        npix = s * s
        P = np.zeros((H * W, npix + 1), dtype=np.float32)
        for oi in range(s):
            h0 = (oi * H) // s
            h1 = -((-(oi + 1) * H) // s)        # ceil((oi+1)*H/s)
            for oj in range(s):
                w0 = (oj * W) // s
                w1 = -((-(oj + 1) * W) // s)
                cnt = (h1 - h0) * (w1 - w0)
                col = oi * s + oj
                for h in range(h0, h1):
                    for w in range(w0, w1):
                        P[h * W + w, col] = 1.0 / cnt
    else:
        npix = H * W
        P = np.zeros((H * W, npix + 1), dtype=np.float32)
        P[np.arange(H * W), np.arange(H * W)] = 1.0
    P[:, npix] = 1.0 / (H * W)                  # global average column
    return jnp.asarray(P), npix


# ----------------------------- wrapper -------------------------------------- #

def projection_conv_forward(x, packed, *, s=4):
    """x: (B, C, H, W) f32 (NCHW).  packed = pack_params(params).
    Returns (x1, x2) with x1: (B, out_dim), x2: (B, out_dim, s*s)."""
    wa_packed, wb_packed = packed
    B, C, H, W = x.shape
    out_dim = wb_packed.shape[1] // 2
    assert wa_packed.shape[0] == C + 1

    pool_mat, npix = _adaptive_pool_matrix(H, W, s)
    x_flat = x.reshape(B, C, H * W)             # free contiguous reshape, no transpose

    x1_raw, x2 = pl.pallas_call(
        _projection_conv_kernel,
        out_shape=(
            jax.ShapeDtypeStruct((B, 1, out_dim), jnp.float32),
            jax.ShapeDtypeStruct((B, out_dim, npix), jnp.float32),
        ),
        grid=(1,),                               # single step: latency-bound op
        in_specs=[
            pl.BlockSpec((B, C, H * W), lambda i: (0, 0, 0)),          # x
            pl.BlockSpec((H * W, npix + 1), lambda i: (0, 0)),         # pooling matrix
            pl.BlockSpec(wa_packed.shape, lambda i: (0, 0)),           # layer-1 pack
            pl.BlockSpec(wb_packed.shape, lambda i: (0, 0)),           # layer-2 pack
        ],
        out_specs=(
            pl.BlockSpec((B, 1, out_dim), lambda i: (0, 0, 0)),
            pl.BlockSpec((B, out_dim, npix), lambda i: (0, 0, 0)),
        ),
        compiler_params=pltpu.CompilerParams(
            dimension_semantics=("arbitrary",)),
    )(x_flat, pool_mat, wa_packed, wb_packed)

    x1 = x1_raw.reshape(B, out_dim)              # squeeze middle 1-dim (free)
    return x1, x2                                # x2 already (B, out_dim, s*s)


# ------------------------ pure-JAX reference -------------------------------- #

def projection_conv_reference(x, params, *, s=4):
    B, C, H, W = x.shape
    g = jnp.mean(x, axis=(2, 3))                                        # (B, C)
    h1 = jnp.maximum(g @ params["w1"].T + params["b1"], 0.0)
    x1 = h1 @ params["w2"].T + params["b2"]                             # (B, out)

    if s:
        bh, bw = H // s, W // s                                         # uniform bins in test
        xp = x.reshape(B, C, s, bh, s, bw).mean(axis=(3, 5))            # (B, C, s, s)
        sp = s * s
    else:
        xp = x
        sp = H * W
    xp_t = xp.reshape(B, C, sp).transpose(0, 2, 1)                      # (B, sp, C)
    hc = jnp.maximum(xp_t @ params["wc1"].T + params["bc1"], 0.0)
    x2 = hc @ params["wc2"].T + params["bc2"]                           # (B, sp, out)
    return x1, x2.transpose(0, 2, 1)                                    # (B, out, sp)


# --------------------------------- main -------------------------------------- #

if __name__ == "__main__":
    B, C, H, W = 2, 32, 16, 16       # in_dim = 32
    hid_dim, out_dim, s = 64, 32, 4

    key = jax.random.PRNGKey(0)
    ks = jax.random.split(key, 9)
    x = jax.random.normal(ks[0], (B, C, H, W), dtype=jnp.float32)

    # PyTorch layout: Linear / 1x1-Conv weights are (out_features, in_features).
    params = {
        "w1":  0.05 * jax.random.normal(ks[1], (hid_dim, C), dtype=jnp.float32),
        "b1":  0.01 * jax.random.normal(ks[2], (hid_dim,), dtype=jnp.float32),
        "w2":  0.05 * jax.random.normal(ks[3], (out_dim, hid_dim), dtype=jnp.float32),
        "b2":  0.01 * jax.random.normal(ks[4], (out_dim,), dtype=jnp.float32),
        "wc1": 0.05 * jax.random.normal(ks[5], (hid_dim, C), dtype=jnp.float32),
        "bc1": 0.01 * jax.random.normal(ks[6], (hid_dim,), dtype=jnp.float32),
        "wc2": 0.05 * jax.random.normal(ks[7], (out_dim, hid_dim), dtype=jnp.float32),
        "bc2": 0.01 * jax.random.normal(ks[8], (out_dim,), dtype=jnp.float32),
    }

    packed = pack_params(params)     # one-time weight packing (static across calls)

    x1, x2 = projection_conv_forward(x, packed, s=s)
    (x1, x2) = jax.block_until_ready((x1, x2))

    r1, r2 = projection_conv_reference(x, params, s=s)
    assert x1.shape == (B, out_dim), x1.shape
    assert x2.shape == (B, out_dim, s * s), x2.shape
    assert jnp.allclose(x1, r1, atol=1e-4, rtol=1e-4), "x1 mismatch vs pure-JAX reference"
    assert jnp.allclose(x2, r2, atol=1e-4, rtol=1e-4), "x2 mismatch vs pure-JAX reference"

    print("KERNEL_OK")
</pallas_src>

<mosaic_0001>
module attributes {stable_mosaic.version = 11 : i64} {
  func.func @_projection_conv_kernel(%arg0: i32, %arg1: memref<2x32x256xf32, #tpu.memory_space<vmem>>, %arg2: memref<256x17xf32, #tpu.memory_space<vmem>>, %arg3: memref<33x128xf32, #tpu.memory_space<vmem>>, %arg4: memref<129x64xf32, #tpu.memory_space<vmem>>, %arg5: memref<2x1x32xf32, #tpu.memory_space<vmem>>, %arg6: memref<2x32x16xf32, #tpu.memory_space<vmem>>) attributes {dimension_semantics = [#tpu.dimension_semantics<arbitrary>], iteration_bounds = array<i64: 1>, scalar_prefetch = 0 : i64, scratch_operands = 0 : i64, tpu.core_type = #tpu.core_type<tc>, window_params = [{pipeline_mode = #tpu.pipeline_mode<synchronous>, transform_indices = @transform_0, window_bounds = array<i64: 2, 32, 256>}, {pipeline_mode = #tpu.pipeline_mode<synchronous>, transform_indices = @transform_1, window_bounds = array<i64: 256, 17>}, {pipeline_mode = #tpu.pipeline_mode<synchronous>, transform_indices = @transform_2, window_bounds = array<i64: 33, 128>}, {pipeline_mode = #tpu.pipeline_mode<synchronous>, transform_indices = @transform_3, window_bounds = array<i64: 129, 64>}, {pipeline_mode = #tpu.pipeline_mode<synchronous>, transform_indices = @transform_4, window_bounds = array<i64: 2, 1, 32>}, {pipeline_mode = #tpu.pipeline_mode<synchronous>, transform_indices = @transform_5, window_bounds = array<i64: 2, 32, 16>}]} {
    %c0 = arith.constant 0 : index
    %c0_0 = arith.constant 0 : index
    %c0_1 = arith.constant 0 : index
    %0 = vector.load %arg1[%c0, %c0_0, %c0_1] : memref<2x32x256xf32, #tpu.memory_space<vmem>>, vector<2x32x256xf32>
    %1 = vector.shape_cast %0 : vector<2x32x256xf32> to vector<64x256xf32>
    %c0_2 = arith.constant 0 : index
    %c0_3 = arith.constant 0 : index
    %2 = vector.load %arg2[%c0_2, %c0_3] : memref<256x17xf32, #tpu.memory_space<vmem>>, vector<256x17xf32>
    %cst = arith.constant dense<0.000000e+00> : vector<64x17xf32>
    %3 = tpu.matmul %1, %2, %cst {dimension_numbers = #tpu.dot_dimension_numbers<[1], [0], [0], [1], [0, 0, 1, 1], [], []>} : vector<64x256xf32>, vector<256x17xf32>, vector<64x17xf32> -> vector<64x17xf32>
    %c0_4 = arith.constant 0 : index
    %c0_5 = arith.constant 0 : index
    %4 = vector.load %arg3[%c0_4, %c0_5] : memref<33x128xf32, #tpu.memory_space<vmem>>, vector<32x128xf32>
    %c32 = arith.constant 32 : index
    %c0_6 = arith.constant 0 : index
    %5 = vector.load %arg3[%c32, %c0_6] : memref<33x128xf32, #tpu.memory_space<vmem>>, vector<1x128xf32>
    %c0_7 = arith.constant 0 : index
    %c0_8 = arith.constant 0 : index
    %6 = vector.load %arg4[%c0_7, %c0_8] : memref<129x64xf32, #tpu.memory_space<vmem>>, vector<128x64xf32>
    %c128 = arith.constant 128 : index
    %c0_9 = arith.constant 0 : index
    %7 = vector.load %arg4[%c128, %c0_9] : memref<129x64xf32, #tpu.memory_space<vmem>>, vector<1x64xf32>
    %8 = vector.extract_strided_slice %3 {offsets = [0, 0], sizes = [32, 17], strides = [1, 1]} : vector<64x17xf32> to vector<32x17xf32>
    %9 = tpu.transpose %8, [1, 0] : vector<32x17xf32> -> vector<17x32xf32>
    %cst_10 = arith.constant dense<0.000000e+00> : vector<17x128xf32>
    %10 = tpu.matmul %9, %4, %cst_10 {dimension_numbers = #tpu.dot_dimension_numbers<[1], [0], [0], [1], [0, 0, 1, 1], [], []>} : vector<17x32xf32>, vector<32x128xf32>, vector<17x128xf32> -> vector<17x128xf32>
    %11 = vector.broadcast %5 : vector<1x128xf32> to vector<17x128xf32>
    %12 = arith.addf %10, %11 : vector<17x128xf32>
    %cst_11 = arith.constant 0.000000e+00 : f32
    %13 = vector.broadcast %cst_11 : f32 to vector<17x128xf32>
    %14 = arith.maximumf %12, %13 : vector<17x128xf32>
    %cst_12 = arith.constant dense<0.000000e+00> : vector<17x64xf32>
    %15 = tpu.matmul %14, %6, %cst_12 {dimension_numbers = #tpu.dot_dimension_numbers<[1], [0], [0], [1], [0, 0, 1, 1], [], []>} : vector<17x128xf32>, vector<128x64xf32>, vector<17x64xf32> -> vector<17x64xf32>
    %16 = vector.broadcast %7 : vector<1x64xf32> to vector<17x64xf32>
    %17 = arith.addf %15, %16 : vector<17x64xf32>
    %18 = vector.extract_strided_slice %17 {offsets = [16, 0], sizes = [1, 32], strides = [1, 1]} : vector<17x64xf32> to vector<1x32xf32>
    %c0_13 = arith.constant 0 : index
    %c0_14 = arith.constant 0 : index
    %c0_15 = arith.constant 0 : index
    %19 = vector.load %arg5[%c0_13, %c0_14, %c0_15] : memref<2x1x32xf32, #tpu.memory_space<vmem>>, vector<1x1x32xf32>
    %20 = vector.shape_cast %19 : vector<1x1x32xf32> to vector<1x32xf32>
    %21 = vector.shape_cast %18 : vector<1x32xf32> to vector<1x1x32xf32>
    tpu.vector_store %arg5[%c0_13, %c0_14, %c0_15], %21 {strides = array<i32>} : memref<2x1x32xf32, #tpu.memory_space<vmem>>, vector<1x1x32xf32>,
    %22 = vector.extract_strided_slice %17 {offsets = [0, 32], sizes = [16, 32], strides = [1, 1]} : vector<17x64xf32> to vector<16x32xf32>
    %23 = tpu.transpose %22, [1, 0] : vector<16x32xf32> -> vector<32x16xf32>
    %c0_16 = arith.constant 0 : index
    %c0_17 = arith.constant 0 : index
    %c0_18 = arith.constant 0 : index
    %24 = vector.load %arg6[%c0_16, %c0_17, %c0_18] : memref<2x32x16xf32, #tpu.memory_space<vmem>>, vector<1x32x16xf32>
    %25 = vector.shape_cast %24 : vector<1x32x16xf32> to vector<32x16xf32>
    %26 = vector.shape_cast %23 : vector<32x16xf32> to vector<1x32x16xf32>
    tpu.vector_store %arg6[%c0_16, %c0_17, %c0_18], %26 {strides = array<i32>} : memref<2x32x16xf32, #tpu.memory_space<vmem>>, vector<1x32x16xf32>,
    %27 = vector.extract_strided_slice %3 {offsets = [32, 0], sizes = [32, 17], strides = [1, 1]} : vector<64x17xf32> to vector<32x17xf32>
    %28 = tpu.transpose %27, [1, 0] : vector<32x17xf32> -> vector<17x32xf32>
    %cst_19 = arith.constant dense<0.000000e+00> : vector<17x128xf32>
    %29 = tpu.matmul %28, %4, %cst_19 {dimension_numbers = #tpu.dot_dimension_numbers<[1], [0], [0], [1], [0, 0, 1, 1], [], []>} : vector<17x32xf32>, vector<32x128xf32>, vector<17x128xf32> -> vector<17x128xf32>
    %30 = vector.broadcast %5 : vector<1x128xf32> to vector<17x128xf32>
    %31 = arith.addf %29, %30 : vector<17x128xf32>
    %cst_20 = arith.constant 0.000000e+00 : f32
    %32 = vector.broadcast %cst_20 : f32 to vector<17x128xf32>
    %33 = arith.maximumf %31, %32 : vector<17x128xf32>
    %cst_21 = arith.constant dense<0.000000e+00> : vector<17x64xf32>
    %34 = tpu.matmul %33, %6, %cst_21 {dimension_numbers = #tpu.dot_dimension_numbers<[1], [0], [0], [1], [0, 0, 1, 1], [], []>} : vector<17x128xf32>, vector<128x64xf32>, vector<17x64xf32> -> vector<17x64xf32>
    %35 = vector.broadcast %7 : vector<1x64xf32> to vector<17x64xf32>
    %36 = arith.addf %34, %35 : vector<17x64xf32>
    %37 = vector.extract_strided_slice %36 {offsets = [16, 0], sizes = [1, 32], strides = [1, 1]} : vector<17x64xf32> to vector<1x32xf32>
    %c1 = arith.constant 1 : index
    %c0_22 = arith.constant 0 : index
    %c0_23 = arith.constant 0 : index
    %38 = vector.load %arg5[%c1, %c0_22, %c0_23] : memref<2x1x32xf32, #tpu.memory_space<vmem>>, vector<1x1x32xf32>
    %39 = vector.shape_cast %38 : vector<1x1x32xf32> to vector<1x32xf32>
    %40 = vector.shape_cast %37 : vector<1x32xf32> to vector<1x1x32xf32>
    tpu.vector_store %arg5[%c1, %c0_22, %c0_23], %40 {strides = array<i32>} : memref<2x1x32xf32, #tpu.memory_space<vmem>>, vector<1x1x32xf32>,
    %41 = vector.extract_strided_slice %36 {offsets = [0, 32], sizes = [16, 32], strides = [1, 1]} : vector<17x64xf32> to vector<16x32xf32>
    %42 = tpu.transpose %41, [1, 0] : vector<16x32xf32> -> vector<32x16xf32>
    %c1_24 = arith.constant 1 : index
    %c0_25 = arith.constant 0 : index
    %c0_26 = arith.constant 0 : index
    %43 = vector.load %arg6[%c1_24, %c0_25, %c0_26] : memref<2x32x16xf32, #tpu.memory_space<vmem>>, vector<1x32x16xf32>
    %44 = vector.shape_cast %43 : vector<1x32x16xf32> to vector<32x16xf32>
    %45 = vector.shape_cast %42 : vector<32x16xf32> to vector<1x32x16xf32>
    tpu.vector_store %arg6[%c1_24, %c0_25, %c0_26], %45 {strides = array<i32>} : memref<2x32x16xf32, #tpu.memory_space<vmem>>, vector<1x32x16xf32>,
    return
  }
  func.func @transform_0(%arg0: i32) -> (i32, i32, i32) {
    %c0_i32 = arith.constant 0 : i32
    %c0_i32_0 = arith.constant 0 : i32
    %c0_i32_1 = arith.constant 0 : i32
    %c0_i32_2 = arith.constant 0 : i32
    return %c0_i32, %c0_i32_0, %c0_i32_1 : i32, i32, i32
  }
  func.func @transform_1(%arg0: i32) -> (i32, i32) {
    %c0_i32 = arith.constant 0 : i32
    %c0_i32_0 = arith.constant 0 : i32
    %c0_i32_1 = arith.constant 0 : i32
    return %c0_i32, %c0_i32_0 : i32, i32
  }
  func.func @transform_2(%arg0: i32) -> (i32, i32) {
    %c0_i32 = arith.constant 0 : i32
    %c0_i32_0 = arith.constant 0 : i32
    %c0_i32_1 = arith.constant 0 : i32
    return %c0_i32, %c0_i32_0 : i32, i32
  }
  func.func @transform_3(%arg0: i32) -> (i32, i32) {
    %c0_i32 = arith.constant 0 : i32
    %c0_i32_0 = arith.constant 0 : i32
    %c0_i32_1 = arith.constant 0 : i32
    return %c0_i32, %c0_i32_0 : i32, i32
  }
  func.func @transform_4(%arg0: i32) -> (i32, i32, i32) {
    %c0_i32 = arith.constant 0 : i32
    %c0_i32_0 = arith.constant 0 : i32
    %c0_i32_1 = arith.constant 0 : i32
    %c0_i32_2 = arith.constant 0 : i32
    return %c0_i32, %c0_i32_0, %c0_i32_1 : i32, i32, i32
  }
  func.func @transform_5(%arg0: i32) -> (i32, i32, i32) {
    %c0_i32 = arith.constant 0 : i32
    %c0_i32_0 = arith.constant 0 : i32
    %c0_i32_1 = arith.constant 0 : i32
    %c0_i32_2 = arith.constant 0 : i32
    return %c0_i32, %c0_i32_0, %c0_i32_1 : i32, i32, i32
  }
}

</mosaic_0001>

<bundles_post_ra>
// kernel: tpu_custom_call.1
= control target key start
LH: loop header
LB: loop body
LE: loop exit
PB: predicated region body
PF: predicated region fallthrough
CT: control target
= control target key end

     0   :  { %s811_s0 = inlined_call_operand.vmem [shape: f32[2,32,256], index: 0, kind: input, shape index: {}]   ;;  %s812_s1 = inlined_call_operand.vmem [shape: f32[256,17], index: 1, kind: input, shape index: {}]   ;;  %s813_s2 = inlined_call_operand.vmem [shape: f32[33,128], index: 2, kind: input, shape index: {}]   ;;  %s814_s3 = inlined_call_operand.vmem [shape: f32[129,64], index: 3, kind: input, shape index: {}]   ;;  %s815_s4 = inlined_call_operand.hbm [shape: f32[2,1,32], index: 4, kind: output, shape index: {0}]   ;;  %s816_s5 = inlined_call_operand.vmem [shape: f32[2,32,16], index: 5, kind: output, shape index: {1}]  }
   0x1   :  { %v51_v0 = vld [vmem:[%s812_s1 + $0x78] sm:$0xff]  ;;  %v50_v2 = vld [vmem:[%s812_s1 + $0x70] sm:$0xff]  ;;  %v49_v4 = vld [vmem:[%s812_s1 + $0x68] sm:$0xff] }
   0x2   :  { %v67_v1 = vld [vmem:[%s812_s1 + $0xf8] sm:$0xff]  ;;  %68 = vmatpush.msra.mxu0 %v51_v0  ;;  %v66_v3 = vld [vmem:[%s812_s1 + $0xf0] sm:$0xff]  ;;  %v65_v5 = vld [vmem:[%s812_s1 + $0xe8] sm:$0xff] }
   0x3   :  { %109 = vmatpush.msra.mxu1 %v67_v1  ;;  %v48_v6 = vld [vmem:[%s812_s1 + $0x60] sm:$0xff]  ;;  %v47_v8 = vld [vmem:[%s812_s1 + $0x58] sm:$0xff]  ;;  %v46_v10 = vld [vmem:[%s812_s1 + $0x50] sm:$0xff] }
   0x4   :  { %69 = vmatpush.msra.mxu0 %v50_v2  ;;  %v64_v7 = vld [vmem:[%s812_s1 + $0xe0] sm:$0xff]  ;;  %v63_v9 = vld [vmem:[%s812_s1 + $0xd8] sm:$0xff]  ;;  %v62_v11 = vld [vmem:[%s812_s1 + $0xd0] sm:$0xff] }
   0x5   :  { %110 = vmatpush.msra.mxu1 %v66_v3  ;;  %v45_v12 = vld [vmem:[%s812_s1 + $0x48] sm:$0xff]  ;;  %v44_v14 = vld [vmem:[%s812_s1 + $0x40] sm:$0xff] }
   0x6   :  { %70 = vmatpush.msra.mxu0 %v49_v4  ;;  %v61_v13 = vld [vmem:[%s812_s1 + $0xc8] sm:$0xff]  ;;  %v60_v15 = vld [vmem:[%s812_s1 + $0xc0] sm:$0xff] }
   0x7   :  { %111 = vmatpush.msra.mxu1 %v65_v5 }
   0x8   :  { %71 = vmatpush.msra.mxu0 %v48_v6 }
   0x9   :  { %112 = vmatpush.msra.mxu1 %v64_v7 }
   0xa   :  { %72 = vmatpush.msra.mxu0 %v47_v8 }
   0xb   :  { %113 = vmatpush.msra.mxu1 %v63_v9 }
   0xc   :  { %73 = vmatpush.msra.mxu0 %v46_v10 }
   0xd   :  { %114 = vmatpush.msra.mxu1 %v62_v11 }
   0xe   :  { %74 = vmatpush.msra.mxu0 %v45_v12 }
   0xf   :  { %115 = vmatpush.msra.mxu1 %v61_v13 }
  0x10   :  { %11 = vsyncpa [#allocation3], 0  ;;  %v43_v16 = vld [vmem:[%s812_s1 + $0x38] sm:$0xff]  ;;  %75 = vmatpush.msra.mxu0 %v44_v14  ;;  %v42_v18 = vld [vmem:[%s812_s1 + $0x30] sm:$0xff]  ;;  %vm205_vm0 = vcmask 261120   ;;  %s526_s27 = smov 96  }
  0x11   :  { %v59_v17 = vld [vmem:[%s812_s1 + $0xb8] sm:$0xff]  ;;  %116 = vmatpush.msra.mxu1 %v60_v15  ;;  %v58_v19 = vld [vmem:[%s812_s1 + $0xb0] sm:$0xff]  ;;  %v41_v20 = vld [vmem:[%s812_s1 + $0x28] sm:$0xff]  ;;  %vm271_vm1 = vcmask 253952   ;;  %s467_s6 = sshll.u32 %s815_s4, 4  ;;  %s528_s7 = smov 16   ;;  %s468_s6 = int_to_ptr.hbm [resolvable:$true] %s467_s6 }
  0x12   :  { %76 = vmatpush.msra.mxu0 %v43_v16  ;;  %v57_v21 = vld [vmem:[%s812_s1 + $0xa8] sm:$0xff]  ;;  %v40_v22 = vld [vmem:[%s812_s1 + $0x20] sm:$0xff]  ;;  %v39_v24 = vld [vmem:[%s812_s1 + $0x18] sm:$0xff]  ;;  %s529_s8 = smov 1   ;;  %vm313_vm2 = vcmask 130048  }
  0x13   :  { %117 = vmatpush.msra.mxu1 %v59_v17  ;;  %v56_v23 = vld [vmem:[%s812_s1 + $0xa0] sm:$0xff]  ;;  %v55_v25 = vld [vmem:[%s812_s1 + $0x98] sm:$0xff]  ;;  %v38_v26 = vld [vmem:[%s812_s1 + $0x10] sm:$0xff] }
  0x14   :  { %77 = vmatpush.msra.mxu0 %v42_v18  ;;  %v54_v27 = vld [vmem:[%s812_s1 + $0x90] sm:$0xff]  ;;  %v37_v28 = vld [vmem:[%s812_s1 + $0x8] sm:$0xff]  ;;  %v36_v30 = vld [vmem:[%s812_s1] sm:$0xff] }
  0x15   :  { %118 = vmatpush.msra.mxu1 %v58_v19  ;;  %v53_v29 = vld [vmem:[%s812_s1 + $0x88] sm:$0xff]  ;;  %v52_v31 = vld [vmem:[%s812_s1 + $0x80] sm:$0xff]  ;;  %v22_v34 = vld [vmem:[%s811_s0 + $0x10] sm:$0xff] }
  0x16   :  { %78 = vmatpush.msra.mxu0 %v41_v20  ;;  %v20_v32 = vld [vmem:[%s811_s0] sm:$0xff]  ;;  %v21_v33 = vld [vmem:[%s811_s0 + $0x8] sm:$0xff]  ;;  %v23_v35 = vld [vmem:[%s811_s0 + $0x18] sm:$0xff] }
  0x17   :  { %119 = vmatpush.msra.mxu1 %v57_v21  ;;  %v24_v36 = vld [vmem:[%s811_s0 + $0x20] sm:$0xff]  ;;  %v25_v37 = vld [vmem:[%s811_s0 + $0x28] sm:$0xff]  ;;  %v26_v38 = vld [vmem:[%s811_s0 + $0x30] sm:$0xff] }
  0x18   :  { %79 = vmatpush.msra.mxu0 %v40_v22  ;;  %v27_v39 = vld [vmem:[%s811_s0 + $0x38] sm:$0xff]  ;;  %v28_v40 = vld [vmem:[%s811_s0 + $0x40] sm:$0xff]  ;;  %v29_v41 = vld [vmem:[%s811_s0 + $0x48] sm:$0xff] }
  0x19   :  { %120 = vmatpush.msra.mxu1 %v56_v23  ;;  %v30_v42 = vld [vmem:[%s811_s0 + $0x50] sm:$0xff]  ;;  %v31_v43 = vld [vmem:[%s811_s0 + $0x58] sm:$0xff]  ;;  %v32_v44 = vld [vmem:[%s811_s0 + $0x60] sm:$0xff] }
  0x1a   :  { %80 = vmatpush.msra.mxu0 %v39_v24  ;;  %v33_v45 = vld [vmem:[%s811_s0 + $0x68] sm:$0xff]  ;;  %v34_v46 = vld [vmem:[%s811_s0 + $0x70] sm:$0xff]  ;;  %v35_v47 = vld [vmem:[%s811_s0 + $0x78] sm:$0xff] }
  0x1b   :  { %121 = vmatpush.msra.mxu1 %v55_v25  ;;  %v153_v60 = vld [vmem:[%s813_s2 + $0x18] sm:$0xff]  ;;  %v152_v61 = vld [vmem:[%s813_s2 + $0x10] sm:$0xff]  ;;  %v151_v62 = vld [vmem:[%s813_s2 + $0x8] sm:$0xff] }
  0x1c   :  { %81 = vmatpush.msra.mxu0 %v38_v26  ;;  %227 = vmatpush.msra.mxu2 %v153_v60  ;;  %v150_v63 = vld [vmem:[%s813_s2] sm:$0xff]  ;;  %v170_v14 = vld [vmem:[%s814_s3 + $0x78] sm:$0xff]  ;;  %v169_v15 = vld [vmem:[%s814_s3 + $0x70] sm:$0xff] }
  0x1d   :  { %122 = vmatpush.msra.mxu1 %v54_v27  ;;  %245 = vmatpush.msra.mxu3 %v170_v14  ;;  %v168_v16 = vld [vmem:[%s814_s3 + $0x68] sm:$0xff]  ;;  %v167_v17 = vld [vmem:[%s814_s3 + $0x60] sm:$0xff]  ;;  %v166_v18 = vld [vmem:[%s814_s3 + $0x58] sm:$0xff] }
  0x1e   :  { %82 = vmatpush.msra.mxu0 %v37_v28  ;;  %228 = vmatpush.msra.mxu2 %v152_v61  ;;  %v165_v20 = vld [vmem:[%s814_s3 + $0x50] sm:$0xff]  ;;  %v164_v21 = vld [vmem:[%s814_s3 + $0x48] sm:$0xff]  ;;  %v163_v22 = vld [vmem:[%s814_s3 + $0x40] sm:$0xff] }
  0x1f   :  { %123 = vmatpush.msra.mxu1 %v53_v29  ;;  %246 = vmatpush.msra.mxu3 %v169_v15  ;;  %v162_v23 = vld [vmem:[%s814_s3 + $0x38] sm:$0xff]  ;;  %v161_v24 = vld [vmem:[%s814_s3 + $0x30] sm:$0xff]  ;;  %v160_v25 = vld [vmem:[%s814_s3 + $0x28] sm:$0xff] }
  0x20   :  { %83 = vmatpush.msra.mxu0 %v36_v30  ;;  %229 = vmatpush.msra.mxu2 %v151_v62  ;;  %v159_v26 = vld [vmem:[%s814_s3 + $0x20] sm:$0xff]  ;;  %v158_v27 = vld [vmem:[%s814_s3 + $0x18] sm:$0xff]  ;;  %v157_v30 = vld [vmem:[%s814_s3 + $0x10] sm:$0xff] }
  0x21   :  { %124 = vmatpush.msra.mxu1 %v52_v31  ;;  %84 = vmatmul.f32.vlgmr.msra.gmra.mxu0 %v20_v32  ;;  %v156_v31 = vld [vmem:[%s814_s3 + $0x8] sm:$0xff]  ;;  %v155_v32 = vld [vmem:[%s814_s3] sm:$0xff] }
  0x22   :  { %125 = vmatmul.f32.vlgmr.msra.gmra.mxu1 %v21_v33  ;;  %230 = vmatpush.msra.mxu2 %v150_v63 }
  0x23   :  { %247 = vmatpush.msra.mxu3 %v168_v16 }
  0x24   :  { %371 = vmatpush.msrb.mxu2 %v153_v60 }
  0x25   :  { %248 = vmatpush.msra.mxu3 %v167_v17 }
  0x26   :  { %372 = vmatpush.msrb.mxu2 %v152_v61 }
  0x27   :  { %249 = vmatpush.msra.mxu3 %v166_v18 }
  0x28   :  { %373 = vmatpush.msrb.mxu2 %v151_v62 }
  0x29   :  { %87 = vmatmul.f32.gmra.mxu0 %v22_v34  ;;  %250 = vmatpush.msra.mxu3 %v165_v20  ;;  %v498_v34 = vld [vmem:[%s813_s2 + $0x20] ss:$0 sm:$0xff] }
  0x2a   :  { %128 = vmatmul.f32.gmra.mxu1 %v23_v35  ;;  %374 = vmatpush.msrb.mxu2 %v150_v63 }
  0x2b   :  { %251 = vmatpush.msra.mxu3 %v164_v21 }
  0x2d   :  { %252 = vmatpush.msra.mxu3 %v163_v22 }
  0x2f   :  { %253 = vmatpush.msra.mxu3 %v162_v23 }
  0x31   :  { %90 = vmatmul.f32.gmra.mxu0 %v24_v36  ;;  %254 = vmatpush.msra.mxu3 %v161_v24 }
  0x32   :  { %131 = vmatmul.f32.gmra.mxu1 %v25_v37 }
  0x33   :  { %255 = vmatpush.msra.mxu3 %v160_v25 }
  0x35   :  { %256 = vmatpush.msra.mxu3 %v159_v26 }
  0x37   :  { %257 = vmatpush.msra.mxu3 %v158_v27 }
  0x39   :  { %93 = vmatmul.f32.gmra.mxu0 %v26_v38  ;;  %258 = vmatpush.msra.mxu3 %v157_v30 }
  0x3a   :  { %134 = vmatmul.f32.gmra.mxu1 %v27_v39 }
  0x3b   :  { %259 = vmatpush.msra.mxu3 %v156_v31 }
  0x3d   :  { %260 = vmatpush.msra.mxu3 %v155_v32 }
  0x41   :  { %96 = vmatmul.f32.gmra.mxu0 %v28_v40 }
  0x42   :  { %137 = vmatmul.f32.gmra.mxu1 %v29_v41 }
  0x49   :  { %99 = vmatmul.f32.gmra.mxu0 %v30_v42 }
  0x4a   :  { %140 = vmatmul.f32.gmra.mxu1 %v31_v43 }
  0x51   :  { %102 = vmatmul.f32.gmra.mxu0 %v32_v44 }
  0x52   :  { %143 = vmatmul.f32.gmra.mxu1 %v33_v45 }
  0x59   :  { %105 = vmatmul.f32.gmra.mxu0 %v34_v46 }
  0x5a   :  { %146 = vmatmul.f32.gmra.mxu1 %v35_v47 }
  0x9e   :  { %v85_v48 = vpop.f32.mrf.mxu0 }
  0x9f   :  { %v126_v49 = vpop.f32.mrf.mxu1 }
  0xa0   :  { %v127_v50 = vadd.f32 %v126_v49, %v85_v48 }
  0xa2   :  { %172 = vxpose.xlu0.b32.start [1/4] (short) (narrow) %v127_v50, 24 }
  0xa6   :  { %v88_v51 = vpop.f32.mrf.mxu0 }
  0xa7   :  { %v129_v52 = vpop.f32.mrf.mxu1 }
  0xa8   :  { %v130_v53 = vadd.f32 %v129_v52, %v88_v51 }
  0xaa   :  { %173 = vxpose.xlu0.b32.cont [2/4] (short) (narrow) %v130_v53, 24  ;;  %v499_v53 = vld [vmem:[%s814_s3 + $0x80] ss:$0 sm:$0xff]  ;;  %s527_s3 = smov [#allocation2]  }
  0xab   :  { %s465_s28 = sshll.u32 %s527_s3, 4  ;;  %s466_s28 = int_to_ptr.vmem [resolvable:$true] %s465_s28 }
  0xae   :  { %v91_v54 = vpop.f32.mrf.mxu0 }
  0xaf   :  { %v132_v55 = vpop.f32.mrf.mxu1 }
  0xb0   :  { %v133_v56 = vadd.f32 %v132_v55, %v91_v54 }
  0xb2   :  { %174 = vxpose.xlu0.b32.cont [3/4] (short) (narrow) %v133_v56, 24 }
  0xb6   :  { %v94_v57 = vpop.f32.mrf.mxu0 }
  0xb7   :  { %v135_v58 = vpop.f32.mrf.mxu1 }
  0xb8   :  { %v136_v59 = vadd.f32 %v135_v58, %v94_v57 }
  0xba   :  { %175 = vxpose.xlu0.b32.end [4/4] (short) (narrow) %v136_v59, 24 }
  0xbe   :  { %v97_v0 = vpop.f32.mrf.mxu0 }
  0xbf   :  { %v138_v1 = vpop.f32.mrf.mxu1 }
  0xc0   :  { %v139_v2 = vadd.f32 %v138_v1, %v97_v0 }
  0xc2   :  { %318 = vxpose.xlu1.b32.start [1/4] (short) (narrow) %v139_v2, 24 }
  0xc6   :  { %v100_v3 = vpop.f32.mrf.mxu0 }
  0xc7   :  { %v141_v4 = vpop.f32.mrf.mxu1 }
  0xc8   :  { %v142_v5 = vadd.f32 %v141_v4, %v100_v3 }
  0xca   :  { %319 = vxpose.xlu1.b32.cont [2/4] (short) (narrow) %v142_v5, 24 }
  0xce   :  { %v103_v6 = vpop.f32.mrf.mxu0 }
  0xcf   :  { %v144_v7 = vpop.f32.mrf.mxu1 }
  0xd0   :  { %v145_v8 = vadd.f32 %v144_v7, %v103_v6 }
  0xd2   :  { %320 = vxpose.xlu1.b32.cont [3/4] (short) (narrow) %v145_v8, 24 }
  0xd6   :  { %v106_v9 = vpop.f32.mrf.mxu0 }
  0xd7   :  { %v147_v10 = vpop.f32.mrf.mxu1 }
  0xd8   :  { %v148_v11 = vadd.f32 %v147_v10, %v106_v9 }
  0xda   :  { %321 = vxpose.xlu1.b32.end [4/4] (short) (narrow) %v148_v11, 24 }
 0x146   :  { %v188_v12 = vpop.trf.xlu0 }
 0x147   :  { %483 = vmatmul.msk.f32.vlgmr.msra.gmra.mxu2 %vm205_vm0, %v188_v12 }
 0x148   :  { %388 = vmatpush.msra.mxu2 %v170_v14 }
 0x14a   :  { %389 = vmatpush.msra.mxu2 %v169_v15 }
 0x14c   :  { %390 = vmatpush.msra.mxu2 %v168_v16 }
 0x14e   :  { %v189_v13 = vpop.trf.xlu0  ;;  %391 = vmatpush.msra.mxu2 %v167_v17 }
 0x14f   :  { %484 = vmatmul.msk.f32.gmra.mxu2 %vm205_vm0, %v189_v13 }
 0x150   :  { %392 = vmatpush.msra.mxu2 %v166_v18 }
 0x152   :  { %393 = vmatpush.msra.mxu2 %v165_v20 }
 0x154   :  { %394 = vmatpush.msra.mxu2 %v164_v21 }
 0x156   :  { %v190_v19 = vpop.trf.xlu0  ;;  %395 = vmatpush.msra.mxu2 %v163_v22 }
 0x157   :  { %485 = vmatmul.msk.f32.gmra.mxu2 %vm205_vm0, %v190_v19 }
 0x158   :  { %396 = vmatpush.msra.mxu2 %v162_v23 }
 0x15a   :  { %397 = vmatpush.msra.mxu2 %v161_v24 }
 0x15c   :  { %398 = vmatpush.msra.mxu2 %v160_v25 }
 0x15e   :  { %399 = vmatpush.msra.mxu2 %v159_v26 }
 0x160   :  { %400 = vmatpush.msra.mxu2 %v158_v27 }
 0x162   :  { %401 = vmatpush.msra.mxu2 %v157_v30 }
 0x164   :  { %402 = vmatpush.msra.mxu2 %v156_v31 }
 0x166   :  { %v334_v28 = vpop.trf.xlu1  ;;  %403 = vmatpush.msra.mxu2 %v155_v32 }
 0x167   :  { %486 = vmatmul.msk.f32.vlgmr.msrb.gmra.mxu2 %vm205_vm0, %v334_v28 }
 0x16e   :  { %v335_v29 = vpop.trf.xlu1 }
 0x16f   :  { %487 = vmatmul.msk.f32.gmra.mxu2 %vm205_vm0, %v335_v29 }
 0x176   :  { %v336_v33 = vpop.trf.xlu1 }
 0x177   :  { %488 = vmatmul.msk.f32.gmra.mxu2 %vm205_vm0, %v336_v33 }
 0x1ca   :  { %v232_v35 = vpop.f32.mrf.mxu2 }
 0x1cb   :  { %v233_v36 = vadd.f32 %v498_v34, %v232_v35 }
 0x1cd   :  { %v241_v37 = vmax.f32 %v233_v36, 0.0 }
 0x1cf   :  { %261 = vmatmul.f32.vlgmr.msra.gmra.mxu3 %v241_v37 }
 0x1d2   :  { %v235_v38 = vpop.f32.mrf.mxu2 }
 0x1d3   :  { %v236_v39 = vadd.f32 %v498_v34, %v235_v38 }
 0x1d5   :  { %v242_v40 = vmax.f32 %v236_v39, 0.0 }
 0x1d7   :  { %264 = vmatmul.f32.gmra.mxu3 %v242_v40 }
 0x1da   :  { %v238_v41 = vpop.f32.mrf.mxu2 }
 0x1db   :  { %v239_v42 = vadd.f32 %v498_v34, %v238_v41 }
 0x1dd   :  { %v243_v43 = vmax.f32 %v239_v42, 0.0 }
 0x1df   :  { %267 = vmatmul.f32.gmra.mxu3 %v243_v43 }
 0x1ea   :  { %v376_v44 = vpop.f32.mrf.mxu2 }
 0x1eb   :  { %v377_v45 = vadd.f32 %v498_v34, %v376_v44 }
 0x1ed   :  { %v385_v46 = vmax.f32 %v377_v45, 0.0 }
 0x1ef   :  { %404 = vmatmul.f32.vlgmr.msra.gmra.mxu2 %v385_v46 }
 0x1f2   :  { %v379_v47 = vpop.f32.mrf.mxu2 }
 0x1f3   :  { %v380_v48 = vadd.f32 %v498_v34, %v379_v47 }
 0x1f5   :  { %v386_v49 = vmax.f32 %v380_v48, 0.0 }
 0x1f7   :  { %407 = vmatmul.f32.gmra.mxu2 %v386_v49 }
 0x1fa   :  { %v382_v50 = vpop.f32.mrf.mxu2 }
 0x1fb   :  { %v383_v51 = vadd.f32 %v498_v34, %v382_v50 }
 0x1fd   :  { %v387_v52 = vmax.f32 %v383_v51, 0.0 }
 0x1ff   :  { %410 = vmatmul.f32.gmra.mxu2 %v387_v52 }
 0x252   :  { %v262_v54 = vpop.f32.mrf.mxu3 }
 0x253   :  { %v263_v55 = vadd.f32 %v499_v53, %v262_v54 }
 0x255   :  { %275 = vrot.lane.b32.xlu2 %v263_v55, %s526_s27 }
 0x25a   :  { %v265_v56 = vpop.f32.mrf.mxu3 }
 0x25b   :  { %v266_v57 = vadd.f32 %v499_v53, %v265_v56 }
 0x25d   :  { %277 = vrot.lane.b32.xlu2 %v266_v57, %s526_s27 }
 0x262   :  { %v268_v58 = vpop.f32.mrf.mxu3 }
 0x263   :  { %v269_v59 = vadd.f32 %v499_v53, %v268_v58 }
 0x265   :  { %272 = vst.msk [vmem:[#allocation2] sm:$0x1] %vm271_vm1, %v269_v59 }
 0x272   :  { %v405_v60 = vpop.f32.mrf.mxu2 }
 0x273   :  { %v406_v61 = vadd.f32 %v499_v53, %v405_v60 }
 0x275   :  { %418 = vrot.lane.b32.xlu0 %v406_v61, %s526_s27 }
 0x27a   :  { %v408_v62 = vpop.f32.mrf.mxu2 }
 0x27b   :  { %v409_v63 = vadd.f32 %v499_v53, %v408_v62 }
 0x27d   :  { %420 = vrot.lane.b32.xlu1 %v409_v63, %s526_s27 }
 0x282   :  { %v411_v2 = vpop.f32.mrf.mxu2 }
 0x283   :  { %v412_v3 = vadd.f32 %v499_v53, %v411_v2 }
 0x285   :  { %415 = vst.msk [vmem:[#allocation2 + $0x1] sm:$0x1] %vm271_vm1, %v412_v3 }
 0x286   :  { %473 = dma.vmem_to_hbm [thread:$0]  %s466_s28, 32, %s468_s6, [#allocation3], %s528_s7, %s528_s7, %s529_s8  }
 0x2af   :  { %v276_v0 = vpop.permute.xlu2 %275 }
 0x2b0   :  { %281 = vxpose.xlu2.b32.start [1/2] (short) (narrow) %v276_v0, 32 }
 0x2b7   :  { %v278_v1 = vpop.permute.xlu2 %277 }
 0x2b8   :  { %282 = vxpose.xlu2.b32.end [2/2] (short) (narrow) %v278_v1, 32 }
 0x2e7   :  { %v419_v4 = vpop.permute.xlu0 %418 }
 0x2e8   :  { %424 = vxpose.xlu2.b32.start [1/2] (short) (narrow) %v419_v4, 32 }
 0x2ef   :  { %v421_v5 = vpop.permute.xlu1 %420 }
 0x2f0   :  { %425 = vxpose.xlu2.b32.end [2/2] (short) (narrow) %v421_v5, 32 }
 0x349   :  { %v297_v6 = vpop.trf.xlu2 }
 0x34a   :  { %314 = vst.msk [vmem:[%s816_s5] sm:$0xff] %vm313_vm2, %v297_v6 }
 0x351   :  { %v298_v7 = vpop.trf.xlu2 }
 0x352   :  { %315 = vst.msk [vmem:[%s816_s5 + $0x8] sm:$0xff] %vm313_vm2, %v298_v7 }
 0x359   :  { %v299_v8 = vpop.trf.xlu2 }
 0x35a   :  { %316 = vst.msk [vmem:[%s816_s5 + $0x10] sm:$0xff] %vm313_vm2, %v299_v8 }
 0x361   :  { %v300_v9 = vpop.trf.xlu2 }
 0x362   :  { %317 = vst.msk [vmem:[%s816_s5 + $0x18] sm:$0xff] %vm313_vm2, %v300_v9 }
 0x381   :  { %v440_v10 = vpop.trf.xlu2 }
 0x382   :  { %489 = vst.msk [vmem:[%s816_s5 + $0x20] sm:$0xff] %vm313_vm2, %v440_v10 }
 0x389   :  { %v441_v11 = vpop.trf.xlu2 }
 0x38a   :  { %490 = vst.msk [vmem:[%s816_s5 + $0x28] sm:$0xff] %vm313_vm2, %v441_v11 }
 0x391   :  { %v442_v12 = vpop.trf.xlu2 }
 0x392   :  { %491 = vst.msk [vmem:[%s816_s5 + $0x30] sm:$0xff] %vm313_vm2, %v442_v12 }
 0x399   :  { %v443_v13 = vpop.trf.xlu2 }
 0x39a   :  { %492 = vst.msk [vmem:[%s816_s5 + $0x38] sm:$0xff] %vm313_vm2, %v443_v13 }
 0x39b   :  { %524 = dma.done.wait [#allocation3], 32  }
 0x39c   :  { %525 = vsyncadd [#allocation3], 4294967264 }
 0x39d   :  { %482 = vsyncpa [#allocation3], 1 }

</bundles_post_ra>
